<compile_context>
chip_gen: v5e
topology: v5e:2x2
jax: 0.10.0
libtpu: 0.0.40
codegen_flags: <defaults>
</compile_context>

<pallas_src>
import math
import functools

import jax
import jax.numpy as jnp
from jax import lax
from jax.experimental import pallas as pl
from jax.experimental.pallas import tpu as pltpu

_MIB = 1024 * 1024


def _qkv_attn_kernel(q_ref, k_ref, v_ref, o_ref, *, scale, matmul_dtype):
    # q_ref/o_ref: (1, nb, C, tq); k_ref/v_ref: (1, nb, C, T).
    q = q_ref[0]                                   # (nb, C, tq)
    k = k_ref[0]                                   # (nb, C, T)
    v = v_ref[0]                                   # (nb, C, T)
    if matmul_dtype is not None:
        q = q.astype(matmul_dtype)
        k = k.astype(matmul_dtype)
        v = v.astype(matmul_dtype)
    # Full 1/sqrt(C) scale applied once to q (== (q*s)(k*s) with s=C**-0.25).
    q = q * jnp.asarray(scale, q.dtype)

    # Key-major scores: w[h, s, t] = sum_c k[h, c, s] * q[h, c, t].
    w = lax.dot_general(k, q, (((1,), (1,)), ((0,), (0,))),
                        preferred_element_type=jnp.float32)        # (nb, T, tq) f32

    # Softmax over the source dim (axis 1) in f32; stats come out (nb, 1, tq).
    w_max = jnp.max(w, axis=1, keepdims=True)                      # (nb, 1, tq)
    w_exp = jnp.exp(w - w_max)                                     # (nb, T, tq) f32
    denom = jnp.sum(w_exp, axis=1, keepdims=True)                  # (nb, 1, tq)

    # Unnormalized probabilities (in [0, 1]) in the matmul dtype.
    p = w_exp.astype(v.dtype)                                      # (nb, T, tq)

    # a[h, c, t] = sum_s v[h, c, s] * p[h, s, t]
    a = lax.dot_general(v, p, (((2,), (1,)), ((0,), (0,))),
                        preferred_element_type=jnp.float32)        # (nb, C, tq) f32

    # Post-matmul normalization: nb*C*tq multiplies instead of nb*T*tq.
    a = a * pl.reciprocal(denom, approx=True)
    o_ref[0] = a.astype(o_ref.dtype)


def _physical_vmem_bytes():
    """Per-generation VMEM capacity; conservative (v7x) fallback if unknown."""
    phys = 64 * _MIB
    try:
        info = pltpu.get_tpu_info()
        cap = getattr(info, "vmem_capacity_bytes", None)
        if cap:
            phys = int(cap)
    except Exception:
        pass
    return phys


def qkv_attention(qkv, n_heads, *, q_block=None, heads_per_block=None,
                  matmul_dtype=None):
    """Pallas equivalent of QKVAttention.forward(qkv) with encoder_kv=None.

    qkv: [N, 3*H*C, T]  ->  returns [N, H*C, T]
    """
    bs, width, length = qkv.shape
    assert width % (3 * n_heads) == 0
    ch = width // (3 * n_heads)
    scale = 1.0 / math.sqrt(ch)
    itemsize = jnp.dtype(matmul_dtype or qkv.dtype).itemsize

    # Generation-aware VMEM policy: ~75% of physical as the scoped limit,
    # ~60% of that as the tile-selection budget.
    phys_vmem = _physical_vmem_bytes()
    vmem_cap = int(phys_vmem * 0.75)
    budget = int(vmem_cap * 0.6)

    # Heads per grid step: amortize per-step overhead / fill sublanes when the
    # per-head channel count is small, without letting K/V buffers dominate.
    if heads_per_block is None:
        nb = 1
        for cand in range(1, n_heads + 1):
            if n_heads % cand != 0:
                continue
            if cand * ch > 128:
                break
            if 2 * 2 * cand * ch * length * itemsize > budget // 3:
                break
            nb = cand
    else:
        nb = int(heads_per_block)
    assert n_heads % nb == 0
    hb_k = n_heads // nb

    def est_bytes(tq):
        kv = 2 * 2 * nb * ch * length * itemsize       # K and V, double-buffered
        qo = 2 * 2 * nb * ch * tq * itemsize           # Q and O, double-buffered
        sc = nb * tq * length * (2 * 4 + itemsize)     # w/w_exp (f32) + cast p
        acc = nb * ch * tq * 4                         # f32 PV accumulator
        return kv + qo + sc + acc

    # VMEM-aware query-dim tile: largest lane-dense tile fitting the budget.
    if q_block is None:
        q_block = length
        if length % 128 == 0:
            cands = sorted({c for c in (2048, 1024, 512, 256, 128, length)
                            if c <= length and length % c == 0}, reverse=True)
            q_block = cands[-1]
            for cand in cands:
                if est_bytes(cand) <= budget:
                    q_block = cand
                    break
    assert length % q_block == 0
    assert q_block == length or q_block % 128 == 0
    num_q = length // q_block

    vmem_limit = int(min(max(int(est_bytes(q_block) * 1.75), 32 * _MIB),
                         vmem_cap))

    # Free dim-split view: [N, 3*H, C, T]; heads are blocks along dim 1.
    qkv4 = qkv.reshape(bs, 3 * n_heads, ch, length)

    grid = (bs, hb_k, num_q)
    q_spec = pl.BlockSpec((1, nb, ch, q_block), lambda b, h, qi: (b, h, 0, qi))
    k_spec = pl.BlockSpec((1, nb, ch, length),
                          lambda b, h, qi: (b, hb_k + h, 0, 0))
    v_spec = pl.BlockSpec((1, nb, ch, length),
                          lambda b, h, qi: (b, 2 * hb_k + h, 0, 0))
    o_spec = pl.BlockSpec((1, nb, ch, q_block), lambda b, h, qi: (b, h, 0, qi))

    out = pl.pallas_call(
        functools.partial(_qkv_attn_kernel, scale=scale,
                          matmul_dtype=matmul_dtype),
        out_shape=jax.ShapeDtypeStruct((bs, n_heads, ch, length), qkv.dtype),
        grid_spec=pltpu.PrefetchScalarGridSpec(
            num_scalar_prefetch=0,
            grid=grid,
            in_specs=[q_spec, k_spec, v_spec],
            out_specs=o_spec,
        ),
        compiler_params=pltpu.CompilerParams(
            # q axis is "arbitrary" so the 2 TCs (v7x) shard batch/head and
            # never duplicate the resident K/V DMA within a head.
            dimension_semantics=("parallel", "parallel", "arbitrary"),
            vmem_limit_bytes=vmem_limit,
        ),
    )(qkv4, qkv4, qkv4)

    return out.reshape(bs, n_heads * ch, length)


def _reference_qkv_attention(qkv, n_heads):
    """Plain-JAX port of the PyTorch forward for verification."""
    bs, width, length = qkv.shape
    ch = width // (3 * n_heads)
    q, k, v = jnp.split(qkv, 3, axis=1)
    q = q.reshape(bs * n_heads, ch, length)
    k = k.reshape(bs * n_heads, ch, length)
    v = v.reshape(bs * n_heads, ch, length)
    scale = 1.0 / math.sqrt(math.sqrt(ch))
    w = jnp.einsum('bct,bcs->bts', q * scale, k * scale)
    w = jax.nn.softmax(w.astype(jnp.float32), axis=-1).astype(w.dtype)
    a = jnp.einsum('bts,bcs->bct', w, v)
    return a.reshape(bs, -1, length)


if __name__ == "__main__":
    key = jax.random.PRNGKey(0)
    n_heads = 2
    ch = 8            # per-head channels
    N = 2             # batch
    T = 256           # sequence length
    width = 3 * n_heads * ch

    qkv = jax.random.normal(key, (N, width, T), dtype=jnp.float32)

    # q_block=128 exercises the tiled q axis (K/V residency + head batching).
    out = qkv_attention(qkv, n_heads, q_block=128)
    out = jax.block_until_ready(out)

    ref = _reference_qkv_attention(qkv, n_heads)
    assert out.shape == (N, n_heads * ch, T), out.shape
    # approx reciprocal in the softmax denominator -> slightly looser tolerance
    assert jnp.allclose(out, ref, atol=5e-3, rtol=5e-3), "mismatch vs reference"

    print("KERNEL_OK")
</pallas_src>

<mosaic_0001>
module attributes {stable_mosaic.version = 11 : i64} {
  func.func @_qkv_attn_kernel(%arg0: i32, %arg1: i32, %arg2: i32, %arg3: memref<1x2x8x128xf32, #tpu.memory_space<vmem>>, %arg4: memref<1x2x8x256xf32, #tpu.memory_space<vmem>>, %arg5: memref<1x2x8x256xf32, #tpu.memory_space<vmem>>, %arg6: memref<1x2x8x128xf32, #tpu.memory_space<vmem>>) attributes {dimension_semantics = [#tpu.dimension_semantics<parallel>, #tpu.dimension_semantics<parallel>, #tpu.dimension_semantics<arbitrary>], iteration_bounds = array<i64: 2, 1, 2>, scalar_prefetch = 0 : i64, scratch_operands = 0 : i64, tpu.core_type = #tpu.core_type<tc>, window_params = [{transform_indices = @transform_0, window_bounds = array<i64: 1, 2, 8, 128>}, {transform_indices = @transform_1, window_bounds = array<i64: 1, 2, 8, 256>}, {transform_indices = @transform_2, window_bounds = array<i64: 1, 2, 8, 256>}, {transform_indices = @transform_3, window_bounds = array<i64: 1, 2, 8, 128>}]} {
    %c0 = arith.constant 0 : index
    %c0_0 = arith.constant 0 : index
    %c0_1 = arith.constant 0 : index
    %c0_2 = arith.constant 0 : index
    %0 = vector.load %arg3[%c0, %c0_0, %c0_1, %c0_2] : memref<1x2x8x128xf32, #tpu.memory_space<vmem>>, vector<1x2x8x128xf32>
    %1 = vector.shape_cast %0 : vector<1x2x8x128xf32> to vector<2x8x128xf32>
    %c0_3 = arith.constant 0 : index
    %c0_4 = arith.constant 0 : index
    %c0_5 = arith.constant 0 : index
    %c0_6 = arith.constant 0 : index
    %2 = vector.load %arg4[%c0_3, %c0_4, %c0_5, %c0_6] : memref<1x2x8x256xf32, #tpu.memory_space<vmem>>, vector<1x2x8x256xf32>
    %3 = vector.shape_cast %2 : vector<1x2x8x256xf32> to vector<2x8x256xf32>
    %c0_7 = arith.constant 0 : index
    %c0_8 = arith.constant 0 : index
    %c0_9 = arith.constant 0 : index
    %c0_10 = arith.constant 0 : index
    %4 = vector.load %arg5[%c0_7, %c0_8, %c0_9, %c0_10] : memref<1x2x8x256xf32, #tpu.memory_space<vmem>>, vector<1x2x8x256xf32>
    %5 = vector.shape_cast %4 : vector<1x2x8x256xf32> to vector<2x8x256xf32>
    %cst = arith.constant 0.353553385 : f32
    %6 = vector.broadcast %cst : f32 to vector<2x8x128xf32>
    %7 = arith.mulf %1, %6 : vector<2x8x128xf32>
    %cst_11 = arith.constant dense<0.000000e+00> : vector<2x256x128xf32>
    %8 = tpu.matmul %3, %7, %cst_11 {dimension_numbers = #tpu.dot_dimension_numbers<[1], [1], [2], [2], [0, 0, 0, 2, 1, 2], [0], [0]>} : vector<2x8x256xf32>, vector<2x8x128xf32>, vector<2x256x128xf32> -> vector<2x256x128xf32>
    %cst_12 = arith.constant dense<0xFF800000> : vector<2x128xf32>
    %9 = vector.multi_reduction <maximumf>, %8, %cst_12 [1] : vector<2x256x128xf32> to vector<2x128xf32>
    %10 = vector.shape_cast %9 : vector<2x128xf32> to vector<2x1x128xf32>
    %11 = vector.broadcast %10 : vector<2x1x128xf32> to vector<2x256x128xf32>
    %12 = arith.subf %8, %11 : vector<2x256x128xf32>
    %13 = math.exp %12 : vector<2x256x128xf32>
    %cst_13 = arith.constant dense<0.000000e+00> : vector<2x128xf32>
    %14 = vector.multi_reduction <add>, %13, %cst_13 [1] : vector<2x256x128xf32> to vector<2x128xf32>
    %15 = vector.shape_cast %14 : vector<2x128xf32> to vector<2x1x128xf32>
    %cst_14 = arith.constant dense<0.000000e+00> : vector<2x8x128xf32>
    %16 = tpu.matmul %5, %13, %cst_14 {dimension_numbers = #tpu.dot_dimension_numbers<[2], [1], [1], [2], [0, 0, 0, 1, 1, 2], [0], [0]>} : vector<2x8x256xf32>, vector<2x256x128xf32>, vector<2x8x128xf32> -> vector<2x8x128xf32>
    %17 = tpu.reciprocal %15 {approx = true} : vector<2x1x128xf32> -> vector<2x1x128xf32>
    %18 = vector.broadcast %17 : vector<2x1x128xf32> to vector<2x8x128xf32>
    %19 = arith.mulf %16, %18 : vector<2x8x128xf32>
    %c0_15 = arith.constant 0 : index
    %c0_16 = arith.constant 0 : index
    %c0_17 = arith.constant 0 : index
    %c0_18 = arith.constant 0 : index
    %20 = vector.load %arg6[%c0_15, %c0_16, %c0_17, %c0_18] : memref<1x2x8x128xf32, #tpu.memory_space<vmem>>, vector<1x2x8x128xf32>
    %21 = vector.shape_cast %20 : vector<1x2x8x128xf32> to vector<2x8x128xf32>
    %22 = vector.shape_cast %19 : vector<2x8x128xf32> to vector<1x2x8x128xf32>
    tpu.vector_store %arg6[%c0_15, %c0_16, %c0_17, %c0_18], %22 {strides = array<i32>} : memref<1x2x8x128xf32, #tpu.memory_space<vmem>>, vector<1x2x8x128xf32>,
    return
  }
  func.func @transform_0(%arg0: i32, %arg1: i32, %arg2: i32) -> (i32, i32, i32, i32) {
    %c0_i32 = arith.constant 0 : i32
    %c0_i32_0 = arith.constant 0 : i32
    return %arg0, %arg1, %c0_i32, %arg2 : i32, i32, i32, i32
  }
  func.func @transform_1(%arg0: i32, %arg1: i32, %arg2: i32) -> (i32, i32, i32, i32) {
    %c1_i32 = arith.constant 1 : i32
    %0 = arith.addi %c1_i32, %arg1 : i32
    %c0_i32 = arith.constant 0 : i32
    %c0_i32_0 = arith.constant 0 : i32
    %c0_i32_1 = arith.constant 0 : i32
    return %arg0, %0, %c0_i32, %c0_i32_0 : i32, i32, i32, i32
  }
  func.func @transform_2(%arg0: i32, %arg1: i32, %arg2: i32) -> (i32, i32, i32, i32) {
    %c2_i32 = arith.constant 2 : i32
    %0 = arith.addi %c2_i32, %arg1 : i32
    %c0_i32 = arith.constant 0 : i32
    %c0_i32_0 = arith.constant 0 : i32
    %c0_i32_1 = arith.constant 0 : i32
    return %arg0, %0, %c0_i32, %c0_i32_0 : i32, i32, i32, i32
  }
  func.func @transform_3(%arg0: i32, %arg1: i32, %arg2: i32) -> (i32, i32, i32, i32) {
    %c0_i32 = arith.constant 0 : i32
    %c0_i32_0 = arith.constant 0 : i32
    return %arg0, %arg1, %c0_i32, %arg2 : i32, i32, i32, i32
  }
}

</mosaic_0001>

<bundles_post_ra>
// kernel: tpu_custom_call.1
= control target key start
LH: loop header
LB: loop body
LE: loop exit
PB: predicated region body
PF: predicated region fallthrough
CT: control target
= control target key end

     0   :  { %s2833_s0 = inlined_call_operand.hbm [shape: f32[2,6,8,256], index: 0, kind: input, shape index: {}]   ;;  %s2834_s1 = inlined_call_operand.hbm [shape: f32[2,6,8,256], index: 1, kind: input, shape index: {}]   ;;  %s2835_s2 = inlined_call_operand.hbm [shape: f32[2,6,8,256], index: 2, kind: input, shape index: {}]   ;;  %s2836_s3 = inlined_call_operand.hbm [shape: f32[2,2,8,256], index: 3, kind: output, shape index: {}]  }
   0x1   :  { %2852 = sst [smem:[#allocation24_spill]] %s2834_s1 }
   0x2   :  { %2853 = sst [smem:[#allocation25_spill]] %s2836_s3 }
   0x3   :  { %8 = vsyncpa [#allocation3], 0 }
   0x4   :  { %10 = vsyncpa [#allocation3 + $0x1], 0 }
   0x5   :  { %11 = vsyncpa [#allocation6], 0 }
   0x6   :  { %13 = vsyncpa [#allocation6 + $0x1], 0 }
   0x7   :  { %14 = vsyncpa [#allocation4], 0 }
   0x8   :  { %16 = vsyncpa [#allocation4 + $0x1], 0  ;;  %s2060_s12 = smov 0   ;;  %s2062_s13 = smov 0  }
   0x9   :  { %s2064_s14 = smov 0   ;;  %s2066_s15 = smov 0  }
   0xa   :  { %s2068_s16 = smov 0   ;;  %s2070_s17 = smov 0  }
   0xb   :  { %s2072_s18 = smov 0   ;;  %s2074_s19 = smov 0  }
   0xc   :  { %s2076_s20 = smov 0   ;;  %s2078_s21 = smov 0  }
   0xd   :  { %s2080_s22 = smov 0  }
   0xe LB: > { %2854 = sst [smem:[#allocation12_spill]] %s1999_s14  ;;  %s2114_s23 = sadd.s32 4294967295, %s2031_s22   ;;  %s2031_s22 = sphi %s2080_s22, %s22_s22   ;;  %s2027_s21 = sphi %s2078_s21, %s2898_s21   ;;  %s2023_s20 = sphi %s2076_s20, %s2891_s20   ;;  %s2019_s19 = sphi %s2074_s19, %s2897_s19   ;;  %s2015_s18 = sphi %s2072_s18, %s2890_s18   ;;  %s2011_s17 = sphi %s2070_s17, %s2889_s17   ;;  %s2007_s16 = sphi %s2068_s16, %s2896_s16   ;;  %s2003_s15 = sphi %s2066_s15, %s2895_s15   ;;  %s1999_s14 = sphi %s2064_s14, %s2887_s14   ;;  %s1995_s13 = sphi %s2062_s13, %s2894_s13   ;;  %s1991_s12 = sphi %s2060_s12, %s2893_s12  }
   0xf   : > { %2855 = sst [smem:[#allocation13_spill]] %s2003_s15  ;;  %p60_p0 = scmp.eq.s32.totalorder %s2031_s22, 0 }
  0x10   : > { %2856 = sst [smem:[#allocation14_spill]] %s2011_s17  ;;  %p66_p1 = scmp.eq.s32.totalorder %s2114_s23, 0 }
  0x11   : > { %2857 = sst [smem:[#allocation15_spill]] %s2015_s18  ;;  %s41_s24 = sadd.s32 1, %s2027_s21 }
  0x12   : > { %2858 = sst [smem:[#allocation16_spill]] %s2019_s19  ;;  %p89_p2 = scmp.ne.s32.totalorder %s1999_s14, %s1995_s13 }
  0x13   : > { %2859 = sst [smem:[#allocation17_spill]] %s2023_s20  ;;  %p95_p3 = scmp.ne.s32.totalorder %s1995_s13, %s1991_s12 }
  0x14   : > { %p91_p4 = por %p89_p2, %p60_p0  ;;  %p2841_p5 = scmp.lt.s32.totalorder %s2031_s22, 4 }
  0x15   : > { %p2127_p6 = por %p95_p3, %p66_p1  ;;  %s205_s26 = sand.u32 1, %s2031_s22  }
  0x16   : > { %s207_s27 = sand.u32 1, %s1999_s14   ;;  %s2837_s29 = smul.u32 96, %s2027_s21 }
  0x17   : > { %s1482_s28 = sshll.u32 %s207_s27, 5  ;;  %p2136_p7 = pnand %p2841_p5, %p91_p4 }
  0x18   : > { %s209_s30 = scalar_lea.vmem [#allocation5], %s1482_s28  ;;  %s2862_s1 = sld [smem:[#allocation24_spill]] }
  0x19   : > { %s221_s4 = sshll.u32 %s209_s30, 4  ;;  %s2145_s11 = scalar_lea.sflag [#allocation6], %s205_s26  ;;  %s222_s4 = int_to_ptr.vmem [resolvable:$true] %s221_s4 }
  0x1a   : > { %s2839_s12 = smov 256   ;;  %s2838_s27 = smov 16  }
  0x1b   : > { %p1486_p8 = scmp.ge.s32.totalorder %s2031_s22, 1  ;;  %s235_s6 = scalar_lea.vmem [#allocation7], %s1482_s28 }
  0x1c   : > { %s2155_s7 = sshll.u32 %s235_s6, 4  ;;  %p255_p9 = scmp.lt.s32.totalorder %s2031_s22, 5  ;;  %s248_s7 = int_to_ptr.vmem [resolvable:$true] %s2155_s7 }
  0x1d   : > { %p59_p12 = scmp.ne.s32.totalorder %s2011_s17, %s2007_s16  ;;  %p65_p13 = scmp.ne.s32.totalorder %s2007_s16, %s2003_s15 }
  0x1e   : > { %s1376_s8 = scalar_lea.hbm %s2862_s1, %s2837_s29  ;;  %p2158_p10 = pnand %p1486_p8, %p255_p9 }
  0x1f   : > { %s1377_s9 = scalar_lea.hbm %s1376_s8, 32  ;;  %s1477_s8 = sadd.s32 4294967294, %s2031_s22  }
  0x20   : > { %s219_s10 = sshll.u32 %s1377_s9, 4  ;;  %s34_s9 = sadd.s32 1, %s2023_s20  ;;  %s220_s10 = int_to_ptr.hbm [resolvable:$true] %s219_s10 }
  0x21   : > { %1577 = dma.hbm_to_vmem [thread:$0]  (!%p2136_p7), %s220_s10, 512, %s222_s4, %s2145_s11, %s2839_s12, %s2839_s12, %s2838_s27  }
  0x22   : > { %s52_s29 = sadd.s32 1, %s2011_s17  ;;  %p35_p11 = scmp.ge.s32.totalorder %s34_s9, 2 }
  0x23   : > { %p153_p2 = scmp.eq.s32.totalorder %s2114_s23, 3  ;;  %p2179_p3 = por %p60_p0, %p59_p12 }
  0x24   : > { %s2900_s9 = smov (%p35_p11, %s34_s9), 0  ;;  %s2902_s24 = smov (!%p35_p11, %s41_s24), %s2027_s21 }
  0x25   : > { %2864 = sst [smem:[#allocation18_spill]] %s2900_s9  ;;  %s48_s28 = ssub.s32 %s2023_s20, %s2900_s9 }
  0x26   : > { %p43_p4 = scmp.ge.s32.totalorder %s2902_s24, 2  ;;  %p2185_p8 = por %p66_p1, %p65_p13 }
  0x27   : > { %p2189_p9 = por %p153_p2, %p59_p12  ;;  %p159_p11 = scmp.eq.s32.totalorder %s1477_s8, 3 }
  0x28   : > { %s2904_s24 = smov (%p43_p4, %s2902_s24), 0  ;;  %s179_s12 = sand.u32 1, %s2011_s17  }
  0x29   : > { %s2867_s6 = scalar_select %p2189_p9, 1, 0 }
  0x2a   : > { %2869 = sst [smem:[#allocation20_spill]] %s2904_s24  ;;  %p2195_p0 = por %p159_p11, %p65_p13 }
  0x2b   : > { %2868 = sst [smem:[#allocation19_spill]] %s2867_s6  ;;  %s45_s30 = ssub.s32 %s2027_s21, %s2904_s24 }
  0x2c   : > { %s2870_s27 = scalar_select %p2195_p0, 1, 0 }
  0x2d   : > { %s49_s1 = sor.u32 %s48_s28, %s45_s30  ;;  %p80_p1 = scmp.eq.s32.totalorder %s45_s30, 0 }
  0x2e   : > { %2871 = sst [smem:[#allocation21_spill]] %s2870_s27  ;;  %p50_p5 = scmp.eq.s32.totalorder %s49_s1, 0 }
  0x2f   : > { %s1480_s9 = sshll.u32 %s179_s12, 4  ;;  %s2872_s15 = sadd.s32 1, %s1999_s14 }
  0x30   : > { %s2205_s3 = scalar_select %p80_p1, %s1999_s14, %s2872_s15  }
  0x31   : > { %s2208_s6 = scalar_select %p50_p5, %s2011_s17, %s52_s29  }
  0x32   : > { %2873 = sst [smem:[#allocation22_spill]] %s2205_s3  ;;  %s1562_s8 = smul.u32 12, %s2027_s21 }
  0x33   : > { %2874 = sst [smem:[#allocation23_spill]] %s2208_s6  ;;  %s183_s18 = scalar_lea.vmem [#allocation2], %s1480_s9 }
  0x34   : > { %s195_s19 = sshll.u32 %s183_s18, 4  ;;  %p2875_p12 = scmp.lt.s32.totalorder %s2031_s22, 4  ;;  %s196_s19 = int_to_ptr.vmem [resolvable:$true] %s195_s19 }
  0x35   : > { %s190_s24 = sadd.s32 %s2023_s20, %s1562_s8  ;;  %s2876_s29 = smul.u32 96, %s2027_s21 }
  0x36   : > { %p1572_p13 = pnand %p2875_p12, %p2179_p3  ;;  %s1481_s28 = sshll.u32 %s190_s24, 3 }
  0x37   : > { %s192_s27 = scalar_lea.hbm %s2833_s0, %s1481_s28  ;;  %s1385_s9 = scalar_lea.hbm %s2835_s2, %s2876_s29 }
  0x38   : > { %s193_s15 = sshll.u32 %s192_s27, 4  ;;  %s180_s18 = scalar_lea.sflag [#allocation3], %s179_s12  ;;  %s194_s15 = int_to_ptr.hbm [resolvable:$true] %s193_s15 }
  0x39   : > { %s2035_s4 = smov 128   ;;  %s2036_s3 = smov 8  }
  0x3a   : > { %s2877_s14 = smov 256   ;;  %s1386_s8 = scalar_lea.hbm %s1385_s9, 64 }
  0x3b   : > { %1574 = dma.hbm_to_vmem [thread:$0]  (!%p1572_p13), %s194_s15, 256, %s196_s19, %s180_s18, %s2877_s14, %s2035_s4, %s2036_s3  }
  0x3c   : > { %s245_s20 = sshll.u32 %s1386_s8, 4  ;;  %s2878_s24 = smov 16   ;;  %s246_s20 = int_to_ptr.hbm [resolvable:$true] %s245_s20 }
  0x3d   : > { %1580 = dma.hbm_to_vmem [thread:$0]  (!%p2136_p7), %s246_s20, 512, %s248_s7, %s2145_s11, %s2877_s14, %s2877_s14, %s2878_s24  }
  0x3e   : > { %259 = sbr.rel (%p2158_p10) target bundleno = 872 (0x368), region = 32  ;;  %s2235_s17 = sand.u32 (!%p2158_p10), 1, %s2007_s16  }
  0x3f   : > { %s1487_s3 = sshll.u32 (!%p2158_p10), %s2235_s17, 4  ;;  %s262_s19 = scalar_lea.sflag (!%p2158_p10), [#allocation3], %s2235_s17 }
  0x40   : > { %s2241_s12 = scalar_lea.vmem (!%p2158_p10), [#allocation2], %s1487_s3 }
  0x43   : > { %1978 = dma.done.wait (%p2185_p8), %s262_s19, 256  }
  0x44   : > { %1980 = vsyncadd (%p2185_p8), %s262_s19, 4294967040  ;;  %s271_s14 = sand.u32 1, %s2114_s23   ;;  %s273_s20 = sand.u32 1, %s1995_s13  }
  0x45   : > { %s2249_s5 = sshll.u32 %s273_s20, 5  ;;  %s272_s11 = scalar_lea.sflag [#allocation6], %s271_s14 }
  0x46   : > { %s275_s27 = scalar_lea.vmem [#allocation5], %s2249_s5 }
  0x47   : > { %1982 = dma.done.wait (%p2127_p6), %s272_s11, 1024  }
  0x48   : > { %1984 = vsyncadd (%p2127_p6), %s272_s11, 4294966272  ;;  %v327_v0 = vld [vmem:[%s275_s27] sm:$0xff]  ;;  %v328_v1 = vld [vmem:[%s275_s27 + $0x8] sm:$0xff]  ;;  %vm401_vm0 = vcmask 64512   ;;  %s2595_s23 = scalar_lea.vmem [#allocation7], %s2249_s5  ;;  %s2879_s25 = sld [smem:[#allocation16_spill]] }
  0x49   : > { %337 = vxpose.xlu0.b32.start.end [1/1] (short) %v327_v0, 128  ;;  %369 = vxpose.xlu1.b32.start.end [1/1] (short) %v328_v1, 128  ;;  %v329_v2 = vld [vmem:[%s275_s27 + $0x10] sm:$0xff]  ;;  %v330_v3 = vld [vmem:[%s275_s27 + $0x18] sm:$0xff]  ;;  %s2880_s7 = sld [smem:[#allocation15_spill]]  ;;  %s318_s26 = scalar_lea.vmem [#allocation8], %s1487_s3 }
  0x4a   : > { %v325_v4 = vld [vmem:[%s2241_s12] sm:$0xff]  ;;  %v326_v30 = vld [vmem:[%s2241_s12 + $0x8] sm:$0xff]  ;;  %s2881_s15 = sld [smem:[#allocation25_spill]]  ;;  %s1327_s4 = sshll.u32 %s318_s26, 4  ;;  %s1328_s4 = int_to_ptr.vmem [resolvable:$true] %s1327_s4 }
  0x4b   : > { %v335_v5 = vmul.f32 0.35355338, %v325_v4  ;;  %v336_v31 = vmul.f32 0.35355338, %v326_v30  ;;  %s1311_s24 = scalar_lea.sflag [#allocation4], %s2235_s17 }
  0x4d   : > { %513 = vmatpush.msra.mxu0 %v335_v5  ;;  %1560 = vmatpush.msra.mxu2 %v335_v5 }
  0x4e   : > { %786 = vmatpush.msra.mxu1 %v336_v31  ;;  %1561 = vmatpush.msra.mxu3 %v336_v31  ;;  %s1556_s10 = sshll.u32 %s2879_s25, 2 }
  0x4f   : > { %s1324_s6 = sadd.s32 %s2880_s7, %s1556_s10 }
  0x50   : > { %s1557_s28 = sshll.u32 %s1324_s6, 3  ;;  %s2882_s29 = smov %s2881_s15 }
  0x51   : > { %s1326_s9 = scalar_lea.hbm %s2881_s15, %s1557_s28  ;;  %s1925_s20 = scalar_lea.hbm %s2882_s29, 64 }
  0x52   : > { %s1329_s8 = sshll.u32 %s1326_s9, 4  ;;  %s1330_s8 = int_to_ptr.hbm [resolvable:$true] %s1329_s8 }
  0x53   : > { %s1919_s3 = sshra.s32 %s1330_s8, 4  ;;  %s1920_s3 = int_to_ptr.hbm [resolvable:$true] %s1919_s3 }
  0x54   : > { %s1921_s19 = scalar_lea.hbm %s1920_s3, 16  ;;  %p1926_p10 = scmp.lt.s32.totalorder %s1920_s3, %s2882_s29 }
  0x55   : > { %p1922_p5 = scmp.ne.s32.totalorder %s1920_s3, %s1921_s19  ;;  %p1927_p2 = scmp.lt.s32.totalorder %s1925_s20, %s1921_s19 }
  0x57   : > { %p1923_p6 = pnand %p1922_p5, %p2189_p9  ;;  %p1928_p3 = por %p1927_p2, %p1926_p10 }
  0x59   : > { %p1924_p7 = pneg %p1923_p6 }
  0x5b   : > { %p1929_p4 = pnand %p1928_p3, %p1924_p7 }
  0xc9   : > { %611 = vxpose.xlu0.b32.start.end [1/1] (short) %v329_v2, 128  ;;  %643 = vxpose.xlu1.b32.start.end [1/1] (short) %v330_v3, 128 }
  0xed   : > { %v353_v6 = vpop.trf.xlu0  ;;  %v2257_v7 = vpop.trf.xlu1 }
  0xee   : > { %1491 = vmatmul.msk.f32.vlgmr.msra.gmra.mxu0 %vm401_vm0, %v353_v6 }
  0xf5   : > { %v354_v8 = vpop.trf.xlu0  ;;  %v2260_v9 = vpop.trf.xlu1 }
  0xf6   : > { %1492 = vmatmul.msk.f32.gmra.mxu0 %vm401_vm0, %v354_v8 }
  0xfd   : > { %v355_v10 = vpop.trf.xlu0  ;;  %v2263_v11 = vpop.trf.xlu1 }
  0xfe   : > { %1493 = vmatmul.msk.f32.gmra.mxu0 %vm401_vm0, %v355_v10 }
 0x105   : > { %v356_v12 = vpop.trf.xlu0  ;;  %v2266_v13 = vpop.trf.xlu1 }
 0x106   : > { %1494 = vmatmul.msk.f32.gmra.mxu0 %vm401_vm0, %v356_v12 }
 0x10d   : > { %v357_v14 = vpop.trf.xlu0  ;;  %v389_v15 = vpop.trf.xlu1 }
 0x10e   : > { %1495 = vmatmul.msk.f32.gmra.mxu0 %vm401_vm0, %v357_v14  ;;  %1511 = vmatmul.msk.f32.vlgmr.msra.gmra.mxu2 %vm401_vm0, %v389_v15 }
 0x115   : > { %v358_v16 = vpop.trf.xlu0  ;;  %v390_v17 = vpop.trf.xlu1 }
 0x116   : > { %1496 = vmatmul.msk.f32.gmra.mxu0 %vm401_vm0, %v358_v16  ;;  %1512 = vmatmul.msk.f32.gmra.mxu2 %vm401_vm0, %v390_v17 }
 0x11d   : > { %v359_v18 = vpop.trf.xlu0  ;;  %v391_v19 = vpop.trf.xlu1 }
 0x11e   : > { %1497 = vmatmul.msk.f32.gmra.mxu0 %vm401_vm0, %v359_v18  ;;  %1513 = vmatmul.msk.f32.gmra.mxu2 %vm401_vm0, %v391_v19 }
 0x125   : > { %v360_v20 = vpop.trf.xlu0  ;;  %v392_v21 = vpop.trf.xlu1 }
 0x126   : > { %1498 = vmatmul.msk.f32.gmra.mxu0 %vm401_vm0, %v360_v20  ;;  %1514 = vmatmul.msk.f32.gmra.mxu2 %vm401_vm0, %v392_v21 }
 0x12d   : > { %v361_v22 = vpop.trf.xlu0  ;;  %v393_v23 = vpop.trf.xlu1 }
 0x12e   : > { %1499 = vmatmul.msk.f32.gmra.mxu0 %vm401_vm0, %v361_v22  ;;  %1515 = vmatmul.msk.f32.gmra.mxu2 %vm401_vm0, %v393_v23 }
 0x135   : > { %v362_v24 = vpop.trf.xlu0  ;;  %v394_v25 = vpop.trf.xlu1 }
 0x136   : > { %1500 = vmatmul.msk.f32.gmra.mxu0 %vm401_vm0, %v362_v24  ;;  %1516 = vmatmul.msk.f32.gmra.mxu2 %vm401_vm0, %v394_v25 }
 0x13d   : > { %v363_v26 = vpop.trf.xlu0  ;;  %v395_v27 = vpop.trf.xlu1 }
 0x13e   : > { %1501 = vmatmul.msk.f32.gmra.mxu0 %vm401_vm0, %v363_v26  ;;  %1517 = vmatmul.msk.f32.gmra.mxu2 %vm401_vm0, %v395_v27 }
 0x145   : > { %v364_v28 = vpop.trf.xlu0  ;;  %v396_v29 = vpop.trf.xlu1 }
 0x146   : > { %1502 = vmatmul.msk.f32.gmra.mxu0 %vm401_vm0, %v364_v28  ;;  %1518 = vmatmul.msk.f32.gmra.mxu2 %vm401_vm0, %v396_v29 }
 0x14d   : > { %v365_v32 = vpop.trf.xlu0  ;;  %v397_v33 = vpop.trf.xlu1 }
 0x14e   : > { %1503 = vmatmul.msk.f32.gmra.mxu0 %vm401_vm0, %v365_v32  ;;  %1519 = vmatmul.msk.f32.gmra.mxu2 %vm401_vm0, %v397_v33 }
 0x155   : > { %v366_v34 = vpop.trf.xlu0  ;;  %v398_v35 = vpop.trf.xlu1 }
 0x156   : > { %1504 = vmatmul.msk.f32.gmra.mxu0 %vm401_vm0, %v366_v34  ;;  %1520 = vmatmul.msk.f32.gmra.mxu2 %vm401_vm0, %v398_v35 }
 0x15d   : > { %v367_v36 = vpop.trf.xlu0  ;;  %v399_v37 = vpop.trf.xlu1 }
 0x15e   : > { %1505 = vmatmul.msk.f32.gmra.mxu0 %vm401_vm0, %v367_v36  ;;  %1521 = vmatmul.msk.f32.gmra.mxu2 %vm401_vm0, %v399_v37 }
 0x165   : > { %v368_v38 = vpop.trf.xlu0  ;;  %v400_v39 = vpop.trf.xlu1 }
 0x166   : > { %1506 = vmatmul.msk.f32.gmra.mxu0 %vm401_vm0, %v368_v38  ;;  %1522 = vmatmul.msk.f32.gmra.mxu2 %vm401_vm0, %v400_v39 }
 0x16b   : > { %v2294_v40 = vpop.f32.mrf.mxu0 }
 0x16d   : > { %v627_v41 = vpop.trf.xlu0  ;;  %v2296_v42 = vpop.trf.xlu1 }
 0x16e   : > { %1507 = vmatmul.msk.f32.gmra.mxu0 %vm401_vm0, %v2257_v7  ;;  %1523 = vmatmul.msk.f32.vlgmr.msra.gmra.mxu1 %vm401_vm0, %v627_v41 }
 0x173   : > { %v2301_v43 = vpop.f32.mrf.mxu0 }
 0x175   : > { %v628_v44 = vpop.trf.xlu0  ;;  %v2303_v45 = vpop.trf.xlu1 }
 0x176   : > { %1508 = vmatmul.msk.f32.gmra.mxu0 %vm401_vm0, %v2260_v9  ;;  %1524 = vmatmul.msk.f32.gmra.mxu1 %vm401_vm0, %v628_v44 }
 0x17b   : > { %v2308_v46 = vpop.f32.mrf.mxu0 }
 0x17c   : > { %v884_v34 = vmax.f32 %v2294_v40, %v2308_v46 }
 0x17d   : > { %v629_v47 = vpop.trf.xlu0  ;;  %v2310_v48 = vpop.trf.xlu1 }
 0x17e   : > { %1509 = vmatmul.msk.f32.gmra.mxu0 %vm401_vm0, %v2263_v11  ;;  %1525 = vmatmul.msk.f32.gmra.mxu1 %vm401_vm0, %v629_v47 }
 0x183   : > { %v2315_v49 = vpop.f32.mrf.mxu0 }
 0x184   : > { %v885_v44 = vmax.f32 %v2301_v43, %v2315_v49 }
 0x185   : > { %v630_v50 = vpop.trf.xlu0  ;;  %v662_v51 = vpop.trf.xlu1 }
 0x186   : > { %1510 = vmatmul.msk.f32.gmra.mxu0 %vm401_vm0, %v2266_v13  ;;  %1526 = vmatmul.msk.f32.gmra.mxu1 %vm401_vm0, %v630_v50 }
 0x187   : > { %1542 = vmatmul.msk.f32.vlgmr.msra.gmra.mxu3 %vm401_vm0, %v662_v51 }
 0x18b   : > { %v2321_v52 = vpop.f32.mrf.mxu0 }
 0x18c   : > { %v886_v35 = vmax.f32 %v884_v34, %v2321_v52 }
 0x18d   : > { %v631_v53 = vpop.trf.xlu0  ;;  %v663_v54 = vpop.trf.xlu1 }
 0x18e   : > { %1527 = vmatmul.msk.f32.gmra.mxu1 %vm401_vm0, %v631_v53 }
 0x18f   : > { %1543 = vmatmul.msk.f32.gmra.mxu3 %vm401_vm0, %v663_v54 }
 0x191   : > { %v2333_v61 = vpop.f32.mrf.mxu2 }
 0x193   : > { %v2325_v55 = vpop.f32.mrf.mxu0 }
 0x194   : > { %v887_v50 = vmax.f32 %v885_v44, %v2325_v55 }
 0x195   : > { %v632_v56 = vpop.trf.xlu0  ;;  %v664_v57 = vpop.trf.xlu1 }
 0x196   : > { %1528 = vmatmul.msk.f32.gmra.mxu1 %vm401_vm0, %v632_v56 }
 0x197   : > { %1544 = vmatmul.msk.f32.gmra.mxu3 %vm401_vm0, %v664_v57 }
 0x199   : > { %v2339_v1 = vpop.f32.mrf.mxu2 }
 0x19b   : > { %v2329_v58 = vpop.f32.mrf.mxu0 }
 0x19c   : > { %v888_v36 = vmax.f32 %v886_v35, %v2329_v58 }
 0x19d   : > { %v633_v59 = vpop.trf.xlu0  ;;  %v665_v60 = vpop.trf.xlu1 }
 0x19e   : > { %1529 = vmatmul.msk.f32.gmra.mxu1 %vm401_vm0, %v633_v59 }
 0x19f   : > { %1545 = vmatmul.msk.f32.gmra.mxu3 %vm401_vm0, %v665_v60 }
 0x1a1   : > { %v2347_v6 = vpop.f32.mrf.mxu2 }
 0x1a3   : > { %v2335_v62 = vpop.f32.mrf.mxu0 }
 0x1a5   : > { %v634_v63 = vpop.trf.xlu0  ;;  %v666_v0 = vpop.trf.xlu1 }
 0x1a6   : > { %1530 = vmatmul.msk.f32.gmra.mxu1 %vm401_vm0, %v634_v63 }
 0x1a7   : > { %1546 = vmatmul.msk.f32.gmra.mxu3 %vm401_vm0, %v666_v0 }
 0x1a9   : > { %v2354_v12 = vpop.f32.mrf.mxu2 }
 0x1ab   : > { %v2341_v2 = vpop.f32.mrf.mxu0 }
 0x1ac   : > { %v890_v38 = vmax.f32 %v888_v36, %v2341_v2 }
 0x1ad   : > { %v635_v3 = vpop.trf.xlu0  ;;  %v667_v4 = vpop.trf.xlu1 }
 0x1ae   : > { %1531 = vmatmul.msk.f32.gmra.mxu1 %vm401_vm0, %v635_v3 }
 0x1af   : > { %1547 = vmatmul.msk.f32.gmra.mxu3 %vm401_vm0, %v667_v4 }
 0x1b1   : > { %v2361_v16 = vpop.f32.mrf.mxu2 }
 0x1b3   : > { %v2345_v5 = vpop.f32.mrf.mxu0 }
 0x1b5   : > { %v636_v7 = vpop.trf.xlu0  ;;  %v668_v8 = vpop.trf.xlu1 }
 0x1b6   : > { %1532 = vmatmul.msk.f32.gmra.mxu1 %vm401_vm0, %v636_v7 }
 0x1b7   : > { %1548 = vmatmul.msk.f32.gmra.mxu3 %vm401_vm0, %v668_v8 }
 0x1b9   : > { %v2367_v20 = vpop.f32.mrf.mxu2 }
 0x1bb   : > { %v2351_v9 = vpop.f32.mrf.mxu0 }
 0x1bc   : > { %v892_v47 = vmax.f32 %v890_v38, %v2351_v9 }
 0x1bd   : > { %v637_v10 = vpop.trf.xlu0  ;;  %v669_v11 = vpop.trf.xlu1 }
 0x1be   : > { %1533 = vmatmul.msk.f32.gmra.mxu1 %vm401_vm0, %v637_v10 }
 0x1bf   : > { %1549 = vmatmul.msk.f32.gmra.mxu3 %vm401_vm0, %v669_v11 }
 0x1c1   : > { %v2375_v25 = vpop.f32.mrf.mxu2 }
 0x1c3   : > { %v2357_v13 = vpop.f32.mrf.mxu0 }
 0x1c5   : > { %v638_v14 = vpop.trf.xlu0  ;;  %v670_v15 = vpop.trf.xlu1 }
 0x1c6   : > { %1534 = vmatmul.msk.f32.gmra.mxu1 %vm401_vm0, %v638_v14 }
 0x1c7   : > { %1550 = vmatmul.msk.f32.gmra.mxu3 %vm401_vm0, %v670_v15 }
 0x1c9   : > { %v2382_v31 = vpop.f32.mrf.mxu2 }
 0x1cb   : > { %v2363_v17 = vpop.f32.mrf.mxu0 }
 0x1cc   : > { %v894_v51 = vmax.f32 %v892_v47, %v2363_v17 }
 0x1cd   : > { %v639_v18 = vpop.trf.xlu0  ;;  %v671_v19 = vpop.trf.xlu1 }
 0x1ce   : > { %1535 = vmatmul.msk.f32.gmra.mxu1 %vm401_vm0, %v639_v18 }
 0x1cf   : > { %1551 = vmatmul.msk.f32.gmra.mxu3 %vm401_vm0, %v671_v19 }
 0x1d1   : > { %v2395_v37 = vpop.f32.mrf.mxu2 }
 0x1d3   : > { %v2369_v21 = vpop.f32.mrf.mxu0 }
 0x1d5   : > { %v640_v22 = vpop.trf.xlu0  ;;  %v672_v23 = vpop.trf.xlu1 }
 0x1d6   : > { %1536 = vmatmul.msk.f32.gmra.mxu1 %vm401_vm0, %v640_v22 }
 0x1d7   : > { %1552 = vmatmul.msk.f32.gmra.mxu3 %vm401_vm0, %v672_v23 }
 0x1d9   : > { %v2413_v57 = vpop.f32.mrf.mxu2 }
 0x1db   : > { %v2373_v24 = vpop.f32.mrf.mxu0 }
 0x1dc   : > { %v896_v53 = vmax.f32 %v894_v51, %v2373_v24 }
 0x1dd   : > { %v641_v26 = vpop.trf.xlu0  ;;  %v673_v27 = vpop.trf.xlu1 }
 0x1de   : > { %1537 = vmatmul.msk.f32.gmra.mxu1 %vm401_vm0, %v641_v26 }
 0x1df   : > { %1553 = vmatmul.msk.f32.gmra.mxu3 %vm401_vm0, %v673_v27 }
 0x1e1   : > { %v2432_v15 = vpop.f32.mrf.mxu2 }
 0x1e3   : > { %v2379_v28 = vpop.f32.mrf.mxu0 }
 0x1e5   : > { %v642_v29 = vpop.trf.xlu0  ;;  %v674_v30 = vpop.trf.xlu1 }
 0x1e6   : > { %1538 = vmatmul.msk.f32.gmra.mxu1 %vm401_vm0, %v642_v29 }
 0x1e7   : > { %1554 = vmatmul.msk.f32.gmra.mxu3 %vm401_vm0, %v674_v30 }
 0x1e9   : > { %v2443_v30 = vpop.f32.mrf.mxu2 }
 0x1eb   : > { %v2385_v32 = vpop.f32.mrf.mxu0  ;;  %v2387_v33 = vpop.f32.mrf.mxu1 }
 0x1ec   : > { %v898_v56 = vmax.f32 %v896_v53, %v2385_v32 }
 0x1ee   : > { %1539 = vmatmul.msk.f32.gmra.mxu1 %vm401_vm0, %v2296_v42  ;;  %v889_v42 = vmax.f32 %v887_v50, %v2335_v62 }
 0x1f0   : > { %v891_v54 = vmax.f32 %v889_v42, %v2345_v5 }
 0x1f2   : > { %v893_v60 = vmax.f32 %v891_v54, %v2357_v13 }
 0x1f3   : > { %v2398_v39 = vpop.f32.mrf.mxu0  ;;  %v2400_v41 = vpop.f32.mrf.mxu1 }
 0x1f6   : > { %1540 = vmatmul.msk.f32.gmra.mxu1 %vm401_vm0, %v2303_v45  ;;  %v895_v45 = vmax.f32 %v893_v60, %v2369_v21 }
 0x1f8   : > { %v897_v4 = vmax.f32 %v895_v45, %v2379_v28 }
 0x1fa   : > { %v899_v8 = vmax.f32 %v897_v4, %v2398_v39 }
 0x1fb   : > { %v2415_v59 = vpop.f32.mrf.mxu0  ;;  %v2419_v0 = vpop.f32.mrf.mxu1 }
 0x1fc   : > { %v900_v63 = vmax.f32 %v898_v56, %v2415_v59 }
 0x1fe   : > { %v902_v3 = vmax.f32 %v900_v63, %v2333_v61  ;;  %1541 = vmatmul.msk.f32.gmra.mxu1 %vm401_vm0, %v2310_v48 }
 0x200   : > { %v904_v7 = vmax.f32 %v902_v3, %v2347_v6 }
 0x202   : > { %v906_v11 = vmax.f32 %v904_v7, %v2361_v16 }
 0x203   : > { %v2428_v10 = vpop.f32.mrf.mxu0  ;;  %v2435_v19 = vpop.f32.mrf.mxu1 }
 0x204   : > { %v901_v14 = vmax.f32 %v899_v8, %v2428_v10  ;;  %v908_v48 = vmax.f32 %v906_v11, %v2375_v25 }
 0x206   : > { %v903_v18 = vmax.f32 %v901_v14, %v2339_v1  ;;  %v910_v26 = vmax.f32 %v908_v48, %v2395_v37 }
 0x208   : > { %v905_v22 = vmax.f32 %v903_v18, %v2354_v12  ;;  %v912_v34 = vmax.f32 %v910_v26, %v2432_v15 }
 0x20a   : > { %v907_v23 = vmax.f32 %v905_v22, %v2367_v20  ;;  %v2461_v3 = vpop.f32.mrf.mxu3 }
 0x20b   : > { %v2447_v36 = vpop.f32.mrf.mxu1 }
 0x20c   : > { %v909_v27 = vmax.f32 %v907_v23, %v2382_v31 }
 0x20e   : > { %v911_v29 = vmax.f32 %v909_v27, %v2413_v57 }
 0x210   : > { %v913_v35 = vmax.f32 %v911_v29, %v2443_v30 }
 0x212   : > { %v914_v38 = vmax.f32 %v912_v34, %v913_v35 }
 0x213   : > { %v2449_v51 = vpop.f32.mrf.mxu1 }
 0x214   : > { %v915_v44 = vrot.slane %v914_v38, 4 }
 0x216   : > { %v916_v47 = vmax.f32 %v914_v38, %v915_v44 }
 0x218   : > { %v917_v50 = vrot.slane %v916_v47, 2 }
 0x21a   : > { %v918_v42 = vmax.f32 %v916_v47, %v917_v50 }
 0x21b   : > { %v2453_v56 = vpop.f32.mrf.mxu1 }
 0x21c   : > { %v919_v53 = vrot.slane %v918_v42, 1 }
 0x21e   : > { %v2451_v54 = vmax.f32 %v918_v42, %v919_v53 }
 0x220   : > { %v958_v60 = vsub.f32 %v2294_v40, %v2451_v54  ;;  %v959_v63 = vsub.f32 %v2301_v43, %v2451_v54  ;;  %v960_v45 = vsub.f32 %v2308_v46, %v2451_v54  ;;  %v961_v4 = vsub.f32 %v2315_v49, %v2451_v54  ;;  %v2473_v49 = vpop.f32.mrf.mxu3 }
 0x221   : > { %v962_v14 = vsub.f32 %v2321_v52, %v2451_v54  ;;  %v963_v40 = vsub.f32 %v2325_v55, %v2451_v54  ;;  %v964_v46 = vsub.f32 %v2329_v58, %v2451_v54  ;;  %v965_v22 = vsub.f32 %v2335_v62, %v2451_v54 }
 0x222   : > { %v1022_v7 = vmul.f32 1.442695, %v958_v60  ;;  %v1024_v8 = vmul.f32 1.442695, %v959_v63  ;;  %v1026_v18 = vmul.f32 1.442695, %v960_v45  ;;  %v966_v26 = vsub.f32 %v2341_v2, %v2451_v54 }
 0x223   : > { %v2465_v11 = vpop.f32.mrf.mxu1  ;;  %v1028_v43 = vmul.f32 1.442695, %v961_v4  ;;  %v1030_v48 = vmul.f32 1.442695, %v962_v14  ;;  %v1032_v23 = vmul.f32 1.442695, %v963_v40  ;;  %v973_v58 = vsub.f32 %v2379_v28, %v2451_v54 }
 0x224   : > { %1683 = vpow2.f32 %v1022_v7  ;;  %v1034_v29 = vmul.f32 1.442695, %v964_v46  ;;  %v967_v34 = vsub.f32 %v2345_v5, %v2451_v54  ;;  %v972_v2 = vsub.f32 %v2373_v24, %v2451_v54 }
 0x225   : > { %1685 = vpow2.f32 %v1024_v8  ;;  %v1036_v38 = vmul.f32 1.442695, %v965_v22  ;;  %v968_v44 = vsub.f32 %v2351_v9, %v2451_v54  ;;  %v1038_v47 = vmul.f32 1.442695, %v966_v26 }
 0x226   : > { %1687 = vpow2.f32 %v1026_v18  ;;  %v971_v5 = vsub.f32 %v2369_v21, %v2451_v54  ;;  %v1052_v42 = vmul.f32 1.442695, %v973_v58  ;;  %v969_v53 = vsub.f32 %v2357_v13, %v2451_v54 }
 0x227   : > { %1689 = vpow2.f32 %v1028_v43  ;;  %v1040_v60 = vmul.f32 1.442695, %v967_v34  ;;  %v970_v9 = vsub.f32 %v2363_v17, %v2451_v54  ;;  %v1050_v4 = vmul.f32 1.442695, %v972_v2 }
 0x228   : > { %1691 = vpow2.f32 %v1030_v48  ;;  %v2505_v63 = vpop.f32.mrf.mxu3  ;;  %v1042_v7 = vmul.f32 1.442695, %v968_v44  ;;  %v1048_v13 = vmul.f32 1.442695, %v971_v5  ;;  %v1044_v18 = vmul.f32 1.442695, %v969_v53 }
 0x229   : > { %1693 = vpow2.f32 %v1032_v23  ;;  %v1046_v46 = vmul.f32 1.442695, %v970_v9  ;;  %v974_v34 = vsub.f32 %v2385_v32, %v2451_v54  ;;  %v989_v44 = vsub.f32 %v2443_v30, %v2451_v54 }
 0x22a   : > { %v2477_v52 = vpop.eup %1683  ;;  %1695 = vpow2.f32 %v1034_v29  ;;  %v988_v53 = vsub.f32 %v2432_v15, %v2451_v54  ;;  %v987_v30 = vsub.f32 %v2413_v57, %v2451_v54  ;;  %v986_v15 = vsub.f32 %v2395_v37, %v2451_v54 }
 0x22b   : > { %v2481_v55 = vpop.f32.mrf.mxu1  ;;  %v2483_v27 = vpop.eup %1685  ;;  %1697 = vpow2.f32 %v1036_v38 }
 0x22c   : > { %v1150_v62 = vadd.f32 %v2483_v27, %v2477_v52  ;;  %v2491_v35 = vpop.eup %1687  ;;  %1699 = vpow2.f32 %v1038_v47 }
 0x22d   : > { %v2498_v50 = vpop.eup %1689  ;;  %1701 = vpow2.f32 %v1052_v42 }
 0x22e   : > { %v1151_v28 = vadd.f32 %v2491_v35, %v1150_v62  ;;  %v2507_v45 = vpop.eup %1691  ;;  %1703 = vpow2.f32 %v1040_v60  ;;  %v976_v60 = vsub.f32 %v2415_v59, %v2451_v54  ;;  %v1082_v59 = vmul.f32 1.442695, %v988_v53 }
 0x22f   : > { %v2514_v14 = vpop.eup %1693  ;;  %1705 = vpow2.f32 %v1050_v4  ;;  %v983_v53 = vsub.f32 %v2367_v20, %v2451_v54 }
 0x230   : > { %v1152_v24 = vadd.f32 %v2498_v50, %v1151_v28  ;;  %v2517_v43 = vpop.eup %1695  ;;  %1707 = vpow2.f32 %v1042_v7  ;;  %v2525_v26 = vpop.f32.mrf.mxu3  ;;  %v975_v28 = vsub.f32 %v2398_v39, %v2451_v54  ;;  %v1084_v7 = vmul.f32 1.442695, %v989_v44 }
 0x231   : > { %v2520_v48 = vpop.eup %1697  ;;  %1709 = vpow2.f32 %v1048_v13  ;;  %v977_v39 = vsub.f32 %v2428_v10, %v2451_v54  ;;  %v985_v10 = vsub.f32 %v2382_v31, %v2451_v54  ;;  %v1078_v44 = vmul.f32 1.442695, %v986_v15 }
 0x232   : > { %v1153_v21 = vadd.f32 %v2507_v45, %v1152_v24  ;;  %v2522_v22 = vpop.eup %1699  ;;  %1711 = vpow2.f32 %v1044_v18  ;;  %v1054_v24 = vmul.f32 1.442695, %v974_v34  ;;  %v979_v34 = vsub.f32 %v2339_v1, %v2451_v54 }
 0x233   : > { %v2512_v8 = vpop.f32.mrf.mxu1  ;;  %v1702_v58 = vpop.eup %1701  ;;  %1713 = vpow2.f32 %v1046_v46  ;;  %v1058_v46 = vmul.f32 1.442695, %v976_v60  ;;  %v1060_v37 = vmul.f32 1.442695, %v977_v39  ;;  %v1076_v1 = vmul.f32 1.442695, %v985_v10 }
 0x234   : > { %v1154_v40 = vadd.f32 %v2514_v14, %v1153_v21  ;;  %v1704_v29 = vpop.eup %1703  ;;  %1224 = vmatpush.msrb.mxu2 %v1702_v58  ;;  %v1056_v21 = vmul.f32 1.442695, %v975_v28  ;;  %1715 = vpow2.f32 %v1054_v24  ;;  %v980_v28 = vsub.f32 %v2347_v6, %v2451_v54 }
 0x235   : > { %v1706_v38 = vpop.eup %1705  ;;  %1717 = vpow2.f32 %v1084_v7 }
 0x236   : > { %v1155_v17 = vadd.f32 %v2517_v43, %v1154_v40  ;;  %v1708_v47 = vpop.eup %1707  ;;  %1225 = vmatpush.msrb.mxu2 %v1706_v38  ;;  %v978_v40 = vsub.f32 %v2333_v61, %v2451_v54  ;;  %1719 = vpow2.f32 %v1056_v21  ;;  %v984_v61 = vsub.f32 %v2375_v25, %v2451_v54 }
 0x237   : > { %v1710_v42 = vpop.eup %1709  ;;  %1721 = vpow2.f32 %v1082_v59  ;;  %v1064_v25 = vmul.f32 1.442695, %v979_v34  ;;  %v1066_v24 = vmul.f32 1.442695, %v980_v28 }
 0x238   : > { %v1156_v23 = vadd.f32 %v2520_v48, %v1155_v17  ;;  %v1712_v32 = vpop.eup %1711  ;;  %1226 = vmatpush.msrb.mxu2 %v1710_v42  ;;  %v2544_v18 = vpop.f32.mrf.mxu3  ;;  %1723 = vpow2.f32 %v1058_v46  ;;  %v1074_v20 = vmul.f32 1.442695, %v984_v61 }
 0x239   : > { %v1714_v4 = vpop.eup %1713 }
 0x23a   : > { %v1157_v62 = vadd.f32 %v2522_v22, %v1156_v23  ;;  %1227 = vmatpush.msrb.mxu2 %v1714_v4  ;;  %v1080_v23 = vmul.f32 1.442695, %v987_v30 }
 0x23b   : > { %v2530_v2 = vpop.f32.mrf.mxu1 }
 0x23c   : > { %v1158_v5 = vadd.f32 %v1704_v29, %v1157_v62  ;;  %1228 = vmatpush.msrb.mxu2 %v1712_v32  ;;  %1725 = vpow2.f32 %v1080_v23 }
 0x23d   : > { %1727 = vpow2.f32 %v1060_v37 }
 0x23e   : > { %v1159_v9 = vadd.f32 %v1708_v47, %v1158_v5  ;;  %1229 = vmatpush.msrb.mxu2 %v1708_v47  ;;  %v1062_v5 = vmul.f32 1.442695, %v978_v40  ;;  %v981_v47 = vsub.f32 %v2354_v12, %v2451_v54  ;;  %1729 = vpow2.f32 %v1078_v44 }
 0x240   : > { %v1160_v13 = vadd.f32 %v1712_v32, %v1159_v9  ;;  %1230 = vmatpush.msrb.mxu2 %v1704_v29  ;;  %v2562_v32 = vpop.eup %1715  ;;  %v2567_v6 = vpop.f32.mrf.mxu3  ;;  %v982_v29 = vsub.f32 %v2361_v16, %v2451_v54  ;;  %1731 = vpow2.f32 %v1062_v5  ;;  %v1072_v9 = vmul.f32 1.442695, %v983_v53 }
 0x241   : > { %v2569_v60 = vpop.eup %1717  ;;  %1733 = vpow2.f32 %v1076_v1  ;;  %v1068_v16 = vmul.f32 1.442695, %v981_v47 }
 0x242   : > { %v1161_v17 = vadd.f32 %v1714_v4, %v1160_v13  ;;  %1231 = vmatpush.msrb.mxu2 %v2522_v22  ;;  %1244 = vmatpush.msrb.mxu3 %v2569_v60  ;;  %1735 = vpow2.f32 %v1064_v25  ;;  %v1070_v7 = vmul.f32 1.442695, %v982_v29  ;;  %v922_v25 = vmax.f32 %v2400_v41, %v2435_v19  ;;  %v332_v29 = vld [vmem:[%s2595_s23 + $0x8] sm:$0xff] }
 0x243   : > { %v2550_v57 = vpop.f32.mrf.mxu1  ;;  %1737 = vpow2.f32 %v1074_v20 }
 0x244   : > { %v1162_v62 = vadd.f32 %v1710_v42, %v1161_v17  ;;  %1232 = vmatpush.msrb.mxu2 %v2520_v48  ;;  %1739 = vpow2.f32 %v1066_v24  ;;  %v924_v20 = vmax.f32 %v922_v25, %v2449_v51 }
 0x245   : > { %1741 = vpow2.f32 %v1072_v9 }
 0x246   : > { %v1163_v31 = vadd.f32 %v1706_v38, %v1162_v62  ;;  %v2573_v38 = vpop.eup %1719  ;;  %1233 = vmatpush.msrb.mxu2 %v2517_v43  ;;  %1743 = vpow2.f32 %v1068_v16  ;;  %v331_v62 = vld [vmem:[%s2595_s23] sm:$0xff]  ;;  %v926_v9 = vmax.f32 %v924_v20, %v2465_v11 }
 0x247   : > { %1745 = vpow2.f32 %v1070_v7 }
 0x248   : > { %v1164_v42 = vadd.f32 %v1702_v58, %v1163_v31  ;;  %v2580_v58 = vpop.eup %1721  ;;  %1234 = vmatpush.msrb.mxu2 %v2514_v14  ;;  %v2587_v59 = vpop.f32.mrf.mxu3 }
 0x249   : > { %v1724_v4 = vpop.eup %1723  ;;  %1245 = vmatpush.msrb.mxu3 %v2580_v58 }
 0x24a   : > { %v1165_v12 = vadd.f32 %v2562_v32, %v1164_v42  ;;  %v1726_v30 = vpop.eup %1725  ;;  %1235 = vmatpush.msrb.mxu2 %v2507_v45 }
 0x24b   : > { %v2578_v22 = vpop.f32.mrf.mxu1  ;;  %v1728_v39 = vpop.eup %1727  ;;  %1246 = vmatpush.msrb.mxu3 %v1726_v30 }
 0x24c   : > { %v1166_v54 = vadd.f32 %v2573_v38, %v1165_v12  ;;  %v1730_v21 = vpop.eup %1729  ;;  %1236 = vmatpush.msrb.mxu2 %v2498_v50 }
 0x24d   : > { %v1732_v13 = vpop.eup %1731  ;;  %1247 = vmatpush.msrb.mxu3 %v1730_v21 }
 0x24e   : > { %v1167_v48 = vadd.f32 %v1724_v4, %v1166_v54  ;;  %v1734_v43 = vpop.eup %1733  ;;  %1237 = vmatpush.msrb.mxu2 %v2491_v35 }
 0x24f   : > { %v1736_v40 = vpop.eup %1735  ;;  %1248 = vmatpush.msrb.mxu3 %v1734_v43 }
 0x250   : > { %v1168_v15 = vadd.f32 %v1728_v39, %v1167_v48  ;;  %v1738_v14 = vpop.eup %1737  ;;  %1238 = vmatpush.msrb.mxu2 %v2483_v27  ;;  %v2599_v44 = vpop.f32.mrf.mxu3 }
 0x251   : > { %v1740_v10 = vpop.eup %1739  ;;  %1249 = vmatpush.msrb.mxu3 %v1738_v14 }
 0x252   : > { %v1169_v46 = vadd.f32 %v1732_v13, %v1168_v15  ;;  %v1742_v34 = vpop.eup %1741  ;;  %1239 = vmatpush.msrb.mxu2 %v2477_v52 }
 0x253   : > { %v2590_v17 = vpop.f32.mrf.mxu1  ;;  %v1744_v45 = vpop.eup %1743  ;;  %1250 = vmatpush.msrb.mxu3 %v1742_v34  ;;  %1240 = vmatmul.f32.vlgmr.msrb.gmra.mxu2 %v331_v62 }
 0x254   : > { %v1170_v23 = vadd.f32 %v1736_v40, %v1169_v46  ;;  %v1746_v61 = vpop.eup %1745 }
 0x255   : > { %1251 = vmatpush.msrb.mxu3 %v1746_v61 }
 0x256   : > { %v1171_v37 = vadd.f32 %v1740_v10, %v1170_v23 }
 0x257   : > { %1252 = vmatpush.msrb.mxu3 %v1744_v45 }
 0x258   : > { %v1172_v50 = vadd.f32 %v1744_v45, %v1171_v37  ;;  %v2603_v53 = vpop.f32.mrf.mxu3 }
 0x259   : > { %1253 = vmatpush.msrb.mxu3 %v1740_v10 }
 0x25a   : > { %v1173_v28 = vadd.f32 %v1746_v61, %v1172_v50 }
 0x25b   : > { %v2601_v35 = vpop.f32.mrf.mxu1  ;;  %1254 = vmatpush.msrb.mxu3 %v1736_v40 }
 0x25c   : > { %v1174_v5 = vadd.f32 %v1742_v34, %v1173_v28 }
 0x25d   : > { %1255 = vmatpush.msrb.mxu3 %v1732_v13 }
 0x25e   : > { %v1175_v27 = vadd.f32 %v1738_v14, %v1174_v5 }
 0x25f   : > { %1256 = vmatpush.msrb.mxu3 %v1728_v39 }
 0x260   : > { %v1176_v31 = vadd.f32 %v1734_v43, %v1175_v27  ;;  %v2617_v12 = vpop.f32.mrf.mxu3 }
 0x261   : > { %1257 = vmatpush.msrb.mxu3 %v1724_v4 }
 0x262   : > { %v1177_v1 = vadd.f32 %v1730_v21, %v1176_v31 }
 0x263   : > { %v2605_v47 = vpop.f32.mrf.mxu1  ;;  %1258 = vmatpush.msrb.mxu3 %v2573_v38  ;;  %v928_v38 = vmax.f32 %v926_v9, %v2512_v8 }
 0x264   : > { %v1178_v52 = vadd.f32 %v1726_v30, %v1177_v1 }
 0x265   : > { %1259 = vmatpush.msrb.mxu3 %v2562_v32  ;;  %v930_v54 = vmax.f32 %v928_v38, %v2550_v57 }
 0x266   : > { %v1179_v42 = vadd.f32 %v2580_v58, %v1178_v52  ;;  %1260 = vmatmul.f32.vlgmr.msrb.gmra.mxu3 %v332_v29  ;;  %v921_v58 = vmax.f32 %v2387_v33, %v2419_v0 }
 0x267   : > { %v932_v32 = vmax.f32 %v930_v54, %v2590_v17 }
 0x268   : > { %v2614_v24 = vadd.f32 %v2569_v60, %v1179_v42  ;;  %v923_v16 = vmax.f32 %v921_v58, %v2447_v36  ;;  %v2629_v30 = vpop.f32.mrf.mxu3 }
 0x269   : > { %v934_v39 = vmax.f32 %v932_v32, %v2605_v47 }
 0x26a   : > { %v925_v60 = vmax.f32 %v923_v16, %v2453_v56 }
 0x26b   : > { %v2620_v4 = vpop.f32.mrf.mxu1 }
 0x26c   : > { %v927_v7 = vmax.f32 %v925_v60, %v2481_v55 }
 0x26e   : > { %v929_v21 = vmax.f32 %v927_v7, %v2530_v2 }
 0x270   : > { %v931_v15 = vmax.f32 %v929_v21, %v2578_v22  ;;  %v2643_v23 = vpop.f32.mrf.mxu3 }
 0x272   : > { %v933_v40 = vmax.f32 %v931_v15, %v2601_v35 }
 0x273   : > { %v2633_v48 = vpop.f32.mrf.mxu1 }
 0x274   : > { %v936_v13 = vmax.f32 %v934_v39, %v2633_v48  ;;  %v935_v14 = vmax.f32 %v933_v40, %v2620_v4 }
 0x276   : > { %v938_v43 = vmax.f32 %v936_v13, %v2461_v3 }
 0x278   : > { %v940_v46 = vmax.f32 %v938_v43, %v2505_v63  ;;  %v2655_v31 = vpop.f32.mrf.mxu3 }
 0x27a   : > { %v942_v10 = vmax.f32 %v940_v46, %v2544_v18 }
 0x27b   : > { %v2645_v34 = vpop.f32.mrf.mxu1 }
 0x27c   : > { %v937_v45 = vmax.f32 %v935_v14, %v2645_v34  ;;  %v944_v37 = vmax.f32 %v942_v10, %v2587_v59 }
 0x27e   : > { %v939_v62 = vmax.f32 %v937_v45, %v2473_v49  ;;  %v946_v50 = vmax.f32 %v944_v37, %v2603_v53 }
 0x280   : > { %v941_v61 = vmax.f32 %v939_v62, %v2525_v26  ;;  %v948_v27 = vmax.f32 %v946_v50, %v2629_v30 }
 0x282   : > { %v943_v28 = vmax.f32 %v941_v61, %v2567_v6  ;;  %v950_v25 = vmax.f32 %v948_v27, %v2655_v31 }
 0x284   : > { %v945_v5 = vmax.f32 %v943_v28, %v2599_v44 }
 0x286   : > { %v947_v1 = vmax.f32 %v945_v5, %v2617_v12 }
 0x288   : > { %v949_v52 = vmax.f32 %v947_v1, %v2643_v23 }
 0x28a   : > { %v951_v42 = vmax.f32 %v949_v52, %v950_v25 }
 0x28c   : > { %v952_v29 = vrot.slane %v951_v42, 4 }
 0x28e   : > { %v953_v20 = vmax.f32 %v951_v42, %v952_v29 }
 0x290   : > { %v954_v9 = vrot.slane %v953_v20, 2 }
 0x292   : > { %v955_v58 = vmax.f32 %v953_v20, %v954_v9 }
 0x294   : > { %v956_v38 = vrot.slane %v955_v58, 1 }
 0x296   : > { %v2660_v16 = vmax.f32 %v955_v58, %v956_v38 }
 0x298   : > { %v990_v54 = vsub.f32 %v2387_v33, %v2660_v16  ;;  %v991_v60 = vsub.f32 %v2400_v41, %v2660_v16  ;;  %v992_v32 = vsub.f32 %v2419_v0, %v2660_v16  ;;  %v993_v7 = vsub.f32 %v2435_v19, %v2660_v16 }
 0x299   : > { %v994_v13 = vsub.f32 %v2447_v36, %v2660_v16  ;;  %v995_v43 = vsub.f32 %v2449_v51, %v2660_v16  ;;  %v996_v41 = vsub.f32 %v2453_v56, %v2660_v16  ;;  %v997_v19 = vsub.f32 %v2465_v11, %v2660_v16 }
 0x29a   : > { %v1086_v39 = vmul.f32 1.442695, %v990_v54  ;;  %v1088_v21 = vmul.f32 1.442695, %v991_v60  ;;  %v1090_v15 = vmul.f32 1.442695, %v992_v32  ;;  %v998_v36 = vsub.f32 %v2481_v55, %v2660_v16 }
 0x29b   : > { %v1092_v33 = vmul.f32 1.442695, %v993_v7  ;;  %v1094_v0 = vmul.f32 1.442695, %v994_v13  ;;  %v1096_v40 = vmul.f32 1.442695, %v995_v43  ;;  %v1005_v51 = vsub.f32 %v2605_v47, %v2660_v16 }
 0x29c   : > { %1747 = vpow2.f32 %v1086_v39  ;;  %v1098_v10 = vmul.f32 1.442695, %v996_v41  ;;  %v999_v56 = vsub.f32 %v2512_v8, %v2660_v16  ;;  %v1004_v37 = vsub.f32 %v2601_v35, %v2660_v16 }
 0x29d   : > { %1749 = vpow2.f32 %v1088_v21  ;;  %v1100_v55 = vmul.f32 1.442695, %v997_v19  ;;  %v1000_v62 = vsub.f32 %v2530_v2, %v2660_v16  ;;  %v1102_v61 = vmul.f32 1.442695, %v998_v36 }
 0x29e   : > { %1751 = vpow2.f32 %v1090_v15  ;;  %v1003_v8 = vsub.f32 %v2590_v17, %v2660_v16  ;;  %v1116_v28 = vmul.f32 1.442695, %v1005_v51  ;;  %v1001_v5 = vsub.f32 %v2550_v57, %v2660_v16 }
 0x29f   : > { %1753 = vpow2.f32 %v1092_v33  ;;  %v1104_v27 = vmul.f32 1.442695, %v999_v56  ;;  %v1002_v2 = vsub.f32 %v2578_v22, %v2660_v16  ;;  %v1114_v52 = vmul.f32 1.442695, %v1004_v37 }
 0x2a0   : > { %1755 = vpow2.f32 %v1094_v0  ;;  %v1106_v25 = vmul.f32 1.442695, %v1000_v62  ;;  %v1112_v29 = vmul.f32 1.442695, %v1003_v8  ;;  %v1108_v57 = vmul.f32 1.442695, %v1001_v5 }
 0x2a1   : > { %1757 = vpow2.f32 %v1096_v40  ;;  %v1110_v58 = vmul.f32 1.442695, %v1002_v2  ;;  %v1006_v39 = vsub.f32 %v2620_v4, %v2660_v16  ;;  %v1021_v15 = vsub.f32 %v2655_v31, %v2660_v16 }
 0x2a2   : > { %v2678_v46 = vpop.eup %1747  ;;  %1759 = vpow2.f32 %v1098_v10  ;;  %v1007_v33 = vsub.f32 %v2633_v48, %v2660_v16  ;;  %v1020_v19 = vsub.f32 %v2643_v23, %v2660_v16  ;;  %v1008_v4 = vsub.f32 %v2645_v34, %v2660_v16 }
 0x2a3   : > { %v2682_v14 = vpop.eup %1749  ;;  %1761 = vpow2.f32 %v1100_v55  ;;  %v1118_v36 = vmul.f32 1.442695, %v1006_v39  ;;  %v1019_v31 = vsub.f32 %v2629_v30, %v2660_v16  ;;  %v1148_v56 = vmul.f32 1.442695, %v1021_v15 }
 0x2a4   : > { %v1187_v11 = vadd.f32 %v2682_v14, %v2678_v46  ;;  %v2690_v45 = vpop.eup %1751  ;;  %1763 = vpow2.f32 %v1102_v61  ;;  %v1009_v48 = vsub.f32 %v2461_v3, %v2660_v16  ;;  %v1018_v23 = vsub.f32 %v2617_v12, %v2660_v16 }
 0x2a5   : > { %v2697_v50 = vpop.eup %1753  ;;  %1765 = vpow2.f32 %v1116_v28  ;;  %v1146_v55 = vmul.f32 1.442695, %v1020_v19  ;;  %v1010_v34 = vsub.f32 %v2473_v49, %v2660_v16  ;;  %v1122_v62 = vmul.f32 1.442695, %v1008_v4 }
 0x2a6   : > { %v1188_v47 = vadd.f32 %v2690_v45, %v1187_v11  ;;  %v2704_v1 = vpop.eup %1755  ;;  %1767 = vpow2.f32 %v1104_v27  ;;  %v1120_v11 = vmul.f32 1.442695, %v1007_v33  ;;  %v1017_v30 = vsub.f32 %v2603_v53, %v2660_v16 }
 0x2a7   : > { %v2709_v17 = vpop.eup %1757  ;;  %1769 = vpow2.f32 %v1114_v52  ;;  %v1011_v3 = vsub.f32 %v2505_v63, %v2660_v16  ;;  %v1124_v8 = vmul.f32 1.442695, %v1009_v48  ;;  %v1016_v12 = vsub.f32 %v2599_v44, %v2660_v16 }
 0x2a8   : > { %v1189_v35 = vadd.f32 %v2697_v50, %v1188_v47  ;;  %v2712_v9 = vpop.eup %1759  ;;  %1771 = vpow2.f32 %v1106_v25  ;;  %v1144_v47 = vmul.f32 1.442695, %v1019_v31  ;;  %v1142_v49 = vmul.f32 1.442695, %v1018_v23 }
 0x2a9   : > { %v2715_v38 = vpop.eup %1761  ;;  %1773 = vpow2.f32 %v1112_v29  ;;  %v1012_v5 = vsub.f32 %v2525_v26, %v2660_v16  ;;  %v1126_v27 = vmul.f32 1.442695, %v1010_v34  ;;  %v1140_v63 = vmul.f32 1.442695, %v1017_v30 }
 0x2aa   : > { %v1190_v42 = vadd.f32 %v2704_v1, %v1189_v35  ;;  %v1764_v54 = vpop.eup %1763  ;;  %1775 = vpow2.f32 %v1108_v57  ;;  %v1015_v35 = vsub.f32 %v2587_v59, %v2660_v16  ;;  %v1013_v52 = vsub.f32 %v2544_v18, %v2660_v16 }
 0x2ab   : > { %v1766_v32 = vpop.eup %1765  ;;  %1777 = vpow2.f32 %v1110_v58  ;;  %v1128_v44 = vmul.f32 1.442695, %v1011_v3  ;;  %v1014_v26 = vsub.f32 %v2567_v6, %v2660_v16  ;;  %v1138_v29 = vmul.f32 1.442695, %v1016_v12 }
 0x2ac   : > { %v1191_v20 = vadd.f32 %v2709_v17, %v1190_v42  ;;  %v1768_v7 = vpop.eup %1767  ;;  %1264 = vmatpush.msra.mxu2 %v1766_v32  ;;  %1779 = vpow2.f32 %v1118_v36  ;;  %v1130_v59 = vmul.f32 1.442695, %v1012_v5  ;;  %v1136_v58 = vmul.f32 1.442695, %v1015_v35 }
 0x2ad   : > { %v1770_v13 = vpop.eup %1769  ;;  %1781 = vpow2.f32 %v1148_v56  ;;  %v1181_v33 = vrot.slane %v2614_v24, 4 }
 0x2ae   : > { %v1192_v22 = vadd.f32 %v2712_v9, %v1191_v20  ;;  %v1772_v43 = vpop.eup %1771  ;;  %1265 = vmatpush.msra.mxu2 %v1770_v13  ;;  %1783 = vpow2.f32 %v1120_v11 }
 0x2af   : > { %v1774_v0 = vpop.eup %1773  ;;  %1785 = vpow2.f32 %v1146_v55  ;;  %v1182_v36 = vadd.f32 %v1181_v33, %v2614_v24 }
 0x2b0   : > { %v1193_v60 = vadd.f32 %v2715_v38, %v1192_v22  ;;  %v1776_v40 = vpop.eup %1775  ;;  %1266 = vmatpush.msra.mxu2 %v1774_v0  ;;  %1787 = vpow2.f32 %v1122_v62 }
 0x2b1   : > { %v1778_v10 = vpop.eup %1777  ;;  %1789 = vpow2.f32 %v1144_v47 }
 0x2b2   : > { %v1194_v21 = vadd.f32 %v1764_v54, %v1193_v60  ;;  %1267 = vmatpush.msra.mxu2 %v1778_v10  ;;  %v2746_v2 = vpop.eup %1779  ;;  %1791 = vpow2.f32 %v1124_v8  ;;  %v1134_v60 = vmul.f32 1.442695, %v1014_v26 }
 0x2b3   : > { %v2750_v42 = vpop.eup %1781  ;;  %1793 = vpow2.f32 %v1142_v49 }
 0x2b4   : > { %v1195_v41 = vadd.f32 %v1768_v7, %v1194_v21  ;;  %1268 = vmatpush.msra.mxu2 %v1776_v40  ;;  %v2754_v57 = vpop.eup %1783  ;;  %1795 = vpow2.f32 %v1126_v27  ;;  %1284 = vmatpush.msra.mxu3 %v2750_v42 }
 0x2b5   : > { %v2759_v18 = vpop.eup %1785  ;;  %1797 = vpow2.f32 %v1140_v63 }
 0x2b6   : > { %v1196_v51 = vadd.f32 %v1772_v43, %v1195_v41  ;;  %1269 = vmatpush.msra.mxu2 %v1772_v43  ;;  %v1788_v22 = vpop.eup %1787  ;;  %1799 = vpow2.f32 %v1128_v44  ;;  %1285 = vmatpush.msra.mxu3 %v2759_v18 }
 0x2b7   : > { %v1790_v16 = vpop.eup %1789  ;;  %1801 = vpow2.f32 %v1138_v29 }
 0x2b8   : > { %v1197_v37 = vadd.f32 %v1776_v40, %v1196_v51  ;;  %1270 = vmatpush.msra.mxu2 %v1768_v7  ;;  %1803 = vpow2.f32 %v1130_v59  ;;  %1286 = vmatpush.msra.mxu3 %v1790_v16 }
 0x2b9   : > { %1805 = vpow2.f32 %v1136_v58 }
 0x2ba   : > { %v1198_v61 = vadd.f32 %v1778_v10, %v1197_v37  ;;  %1271 = vmatpush.msra.mxu2 %v1764_v54  ;;  %v1132_v54 = vmul.f32 1.442695, %v1013_v52  ;;  %v1183_v10 = vrot.slane %v1182_v36, 2  ;;  %v334_v37 = vld [vmem:[%s2595_s23 + $0x18] sm:$0xff] }
 0x2bc   : > { %v1199_v28 = vadd.f32 %v1774_v0, %v1198_v61  ;;  %1272 = vmatpush.msra.mxu2 %v2715_v38  ;;  %1807 = vpow2.f32 %v1132_v54  ;;  %v1184_v56 = vadd.f32 %v1183_v10, %v1182_v36 }
 0x2bd   : > { %1809 = vpow2.f32 %v1134_v60 }
 0x2be   : > { %v1200_v53 = vadd.f32 %v1770_v13, %v1199_v28  ;;  %1273 = vmatpush.msra.mxu2 %v2712_v9  ;;  %v1185_v11 = vrot.slane %v1184_v56, 1 }
 0x2c0   : > { %v1201_v25 = vadd.f32 %v1766_v32, %v1200_v53  ;;  %v1792_v32 = vpop.eup %1791  ;;  %1274 = vmatpush.msra.mxu2 %v2709_v17  ;;  %v1186_v23 = vadd.f32 %v1185_v11, %v1184_v56 }
 0x2c1   : > { %v1794_v38 = vpop.eup %1793 }
 0x2c2   : > { %v1202_v20 = vadd.f32 %v2746_v2, %v1201_v25  ;;  %v1796_v39 = vpop.eup %1795  ;;  %1287 = vmatpush.msra.mxu3 %v1794_v38  ;;  %1275 = vmatpush.msra.mxu2 %v2704_v1  ;;  %v333_v1 = vld [vmem:[%s2595_s23 + $0x10] sm:$0xff]  ;;  %1811 = vrcp.f32 %v1186_v23 }
 0x2c3   : > { %v1798_v13 = vpop.eup %1797 }
 0x2c4   : > { %v1203_v6 = vadd.f32 %v2754_v57, %v1202_v20  ;;  %v1800_v9 = vpop.eup %1799  ;;  %1288 = vmatpush.msra.mxu3 %v1798_v13  ;;  %1276 = vmatpush.msra.mxu2 %v2697_v50 }
 0x2c5   : > { %v1802_v43 = vpop.eup %1801 }
 0x2c6   : > { %v1204_v7 = vadd.f32 %v1788_v22, %v1203_v6  ;;  %v1804_v17 = vpop.eup %1803  ;;  %1289 = vmatpush.msra.mxu3 %v1802_v43  ;;  %1277 = vmatpush.msra.mxu2 %v2690_v45 }
 0x2c7   : > { %v1806_v0 = vpop.eup %1805 }
 0x2c8   : > { %v1205_v21 = vadd.f32 %v1792_v32, %v1204_v7  ;;  %v1808_v19 = vpop.eup %1807  ;;  %1290 = vmatpush.msra.mxu3 %v1806_v0  ;;  %1278 = vmatpush.msra.mxu2 %v2682_v14 }
 0x2c9   : > { %v1810_v4 = vpop.eup %1809 }
 0x2ca   : > { %v1206_v15 = vadd.f32 %v1796_v39, %v1205_v21  ;;  %1291 = vmatpush.msra.mxu3 %v1810_v4  ;;  %1279 = vmatpush.msra.mxu2 %v2678_v46  ;;  %v1812_v30 = vpop.eup %1811 }
 0x2cb   : > { %1280 = vmatmul.f32.vlgmr.msra.gmra.mxu2 %v333_v1 }
 0x2cc   : > { %v1207_v41 = vadd.f32 %v1800_v9, %v1206_v15  ;;  %1292 = vmatpush.msra.mxu3 %v1808_v19 }
 0x2ce   : > { %v1208_v40 = vadd.f32 %v1804_v17, %v1207_v41  ;;  %1293 = vmatpush.msra.mxu3 %v1804_v17 }
 0x2d0   : > { %v1209_v51 = vadd.f32 %v1808_v19, %v1208_v40  ;;  %1294 = vmatpush.msra.mxu3 %v1800_v9 }
 0x2d2   : > { %v1210_v50 = vadd.f32 %v1810_v4, %v1209_v51  ;;  %1295 = vmatpush.msra.mxu3 %v1796_v39 }
 0x2d4   : > { %v1211_v45 = vadd.f32 %v1806_v0, %v1210_v50  ;;  %1296 = vmatpush.msra.mxu3 %v1792_v32 }
 0x2d6   : > { %v1212_v31 = vadd.f32 %v1802_v43, %v1211_v45  ;;  %1297 = vmatpush.msra.mxu3 %v1788_v22  ;;  %v1241_v34 = vpop.f32.mrf.mxu2 }
 0x2d8   : > { %v1213_v48 = vadd.f32 %v1798_v13, %v1212_v31  ;;  %1298 = vmatpush.msra.mxu3 %v2754_v57 }
 0x2da   : > { %v1214_v14 = vadd.f32 %v1794_v38, %v1213_v48  ;;  %1299 = vmatpush.msra.mxu3 %v2746_v2 }
 0x2db   : > { %1300 = vmatmul.f32.vlgmr.msra.gmra.mxu3 %v334_v37 }
 0x2dc   : > { %v1215_v24 = vadd.f32 %v1790_v16, %v1214_v14 }
 0x2de   : > { %v1216_v46 = vadd.f32 %v2759_v18, %v1215_v24 }
 0x2e0   : > { %v1217_v55 = vadd.f32 %v2750_v42, %v1216_v46 }
 0x2e2   : > { %v1218_v3 = vrot.slane %v1217_v55, 4 }
 0x2e4   : > { %v1219_v8 = vadd.f32 %v1218_v3, %v1217_v55 }
 0x2e6   : > { %v1220_v28 = vrot.slane %v1219_v8, 2 }
 0x2e8   : > { %v1221_v12 = vadd.f32 %v1220_v28, %v1219_v8 }
 0x2e9   : > { %v1261_v62 = vpop.f32.mrf.mxu3 }
 0x2ea   : > { %v1262_v61 = vadd.f32 %v1261_v62, %v1241_v34  ;;  %v1222_v49 = vrot.slane %v1221_v12, 1 }
 0x2ec   : > { %v1306_v47 = vmul.f32 %v1812_v30, %v1262_v61  ;;  %v1223_v5 = vadd.f32 %v1222_v49, %v1221_v12 }
 0x2ee   : > { %1308 = vst [vmem:[%s318_s26] sm:$0xff] %v1306_v47  ;;  %1813 = vrcp.f32 %v1223_v5 }
 0x2f4   : > { %v1814_v63 = vpop.eup %1813 }
 0x34e   : > { %v1281_v27 = vpop.f32.mrf.mxu2 }
 0x35e   : > { %v1301_v53 = vpop.f32.mrf.mxu3 }
 0x35f   : > { %v1302_v35 = vadd.f32 %v1301_v53, %v1281_v27 }
 0x361   : > { %v1307_v2 = vmul.f32 %v1814_v63, %v1302_v35 }
 0x363   : > { %1309 = vst [vmem:[%s318_s26 + $0x8] sm:$0xff] %v1307_v2 }
 0x364   : > { %1932 = shalt.err (!%p1929_p4)
}
 0x365   : > { %s2037_s17 = smov 128   ;;  %s2038_s27 = smov 256  }
 0x366   : > { %s2039_s23 = smov 8  }
 0x367   : > { %1569 = dma.vmem_to_hbm [thread:$0]  (%p2189_p9), %s1328_s4, 256, %s1330_s8, %s1311_s24, %s2037_s17, %s2038_s27, %s2039_s23  }
 0x368 PF: > { %s2884_s25 = sld [smem:[#allocation13_spill]]  ;;  %p1586_p8 = scmp.ge.s32.totalorder %s2031_s22, 2 }
 0x36a   : > { %p1582_p11 = pnand %p1586_p8, %p2195_p0 }
 0x36c   : > { %p1583_p1 = pneg %p1582_p11 }
 0x36e   : > { %s1344_s26 = sand.u32 1, %s2884_s25  }
 0x36f   : > { %s1345_s10 = scalar_lea.sflag [#allocation4], %s1344_s26 }
 0x370   : > { %1986 = dma.done.wait (%p1583_p1), %s1345_s10, 256  }
 0x371   : > { %1988 = vsyncadd (%p1583_p1), %s1345_s10, 4294967040  ;;  %s22_s22 = sadd.s32 1, %s2031_s22   ;;  %s2886_s6 = sld [smem:[#allocation12_spill]] }
 0x372   : > { %p19_p12 = scmp.ge.s32.totalorder %s22_s22, 6   ;;  %s2887_s14 = sld [smem:[#allocation22_spill]] }
 0x373   : > { %s2888_s28 = sld [smem:[#allocation14_spill]]  ;;  %s2893_s12 = smov %s1995_s13 }
 0x374   : > { %s2889_s17 = sld [smem:[#allocation23_spill]]  ;;  %s2895_s15 = smov %s2007_s16 }
 0x375   : > { %s2890_s18 = sld [smem:[#allocation17_spill]]  ;;  %s2897_s19 = smov %s2027_s21 }
 0x376   : > { %s2891_s20 = sld [smem:[#allocation18_spill]] }
 0x377   : > { %s2892_s30 = sld [smem:[#allocation20_spill]]  ;;  %s2894_s13 = smov %s2886_s6 }
 0x379   : > { %s2896_s16 = smov %s2888_s28  ;;  %21 = sbr.rel (!%p19_p12) target bundleno = 14 (0xe), region = 101 }
 0x37d   : > { %s2898_s21 = smov %s2892_s30 }
 0x37e   :  { %1351 = vsyncpa [#allocation3], 1 }
 0x37f   :  { %1353 = vsyncpa [#allocation3 + $0x1], 1 }
 0x380   :  { %1354 = vsyncpa [#allocation6], 1 }
 0x381   :  { %1356 = vsyncpa [#allocation6 + $0x1], 1 }
 0x382   :  { %1357 = vsyncpa [#allocation4], 1 }
 0x383   :  { %1359 = vsyncpa [#allocation4 + $0x1], 1 }

</bundles_post_ra>
